<compile_context>
chip_gen: v5e
topology: v5e:2x2
jax: 0.10.0
libtpu: 0.0.40
codegen_flags: <defaults>
</compile_context>

<pallas_src>
import functools

import jax
import jax.numpy as jnp
from jax import lax
from jax.experimental import pallas as pl
from jax.experimental.pallas import tpu as pltpu


def _channel_attention_kernel(x_ref, w1t_ref, w2t_ref, o_ref,
                              sum_ref, max_ref, *,
                              hw_total, hw_tile, acc_w):
    # x_ref  : (b_tile, C, hw_tile)  streamed spatial tile (native dtype)
    # w1t_ref: (C, Ch)               f1 weight, pre-transposed (Ch = C // ratio)
    # w2t_ref: (Ch, C)               f2 weight, pre-transposed
    # o_ref  : (b_tile, 1, C)        sigmoid gate (written on last HW tile)
    # sum_ref/max_ref: (b_tile, C, acc_w) f32 lane-resident accumulators
    hw_idx = pl.program_id(1)
    n_hw = pl.num_programs(1)
    n_slabs = hw_tile // acc_w
    ragged = (hw_total % hw_tile) != 0

    @pl.when(hw_idx == 0)
    def _init():
        sum_ref[...] = jnp.zeros_like(sum_ref)
        max_ref[...] = jnp.full_like(max_ref, -jnp.inf)

    def _accumulate(masked):
        if masked:
            # Lane-only iota; broadcasting handles (b_tile, C) for free.
            lane = lax.broadcasted_iota(jnp.int32, (1, 1, acc_w), 2)
            tile_base = hw_idx * hw_tile

        def _load(start):
            if not isinstance(start, int):
                start = pl.multiple_of(start, acc_w)
            v = x_ref[:, :, pl.ds(start, acc_w)].astype(jnp.float32)
            if masked:
                valid = (tile_base + start + lane) < hw_total
                return jnp.where(valid, v, 0.0), jnp.where(valid, v, -jnp.inf)
            return v, v

        def _pair(i):
            # Combine two slabs in registers first -> one accumulator RMW.
            start = i * (2 * acc_w)
            s0, m0 = _load(start)
            s1, m1 = _load(start + acc_w)
            sum_ref[...] += s0 + s1
            max_ref[...] = jnp.maximum(max_ref[...], jnp.maximum(m0, m1))

        n_pairs, rem = divmod(n_slabs, 2)
        if n_pairs > 0:
            if n_pairs <= 16:
                for i in range(n_pairs):          # small static unroll
                    _pair(i)
            else:
                def body(i, carry):               # keep code size bounded
                    _pair(i)
                    return carry
                lax.fori_loop(0, n_pairs, body, 0)
        if rem:
            s0, m0 = _load((n_slabs - 1) * acc_w)
            sum_ref[...] += s0
            max_ref[...] = jnp.maximum(max_ref[...], m0)

    if ragged:
        # Only the LAST HW tile can contain padded lanes: keep the hot loop at
        # 2 VALU ops/element and run the iota/compare/select path exactly once.
        @pl.when(hw_idx < n_hw - 1)
        def _full_tiles():
            _accumulate(masked=False)

        @pl.when(hw_idx == n_hw - 1)
        def _tail_tile():
            _accumulate(masked=True)
    else:
        _accumulate(masked=False)

    @pl.when(hw_idx == n_hw - 1)
    def _finalize():
        # Single cross-lane (XLU) reduction of the lane-resident accumulators.
        avg = jnp.sum(sum_ref[...], axis=-1) * jnp.float32(1.0 / hw_total)
        mx = jnp.max(max_ref[...], axis=-1)                   # (b_tile, C)
        bt = avg.shape[0]

        # Fused MLP: one matmul pair over stacked [avg; max].
        p = jnp.concatenate([avg, mx], axis=0)                # (2*b_tile, C)
        w1t = w1t_ref[...].astype(jnp.float32)                # (C, Ch)
        w2t = w2t_ref[...].astype(jnp.float32)                # (Ch, C)
        h = jnp.maximum(jnp.dot(p, w1t, preferred_element_type=jnp.float32), 0.0)
        y = jnp.dot(h, w2t, preferred_element_type=jnp.float32)
        out = jax.nn.sigmoid(y[:bt] + y[bt:])                 # (b_tile, C)
        o_ref[...] = jnp.expand_dims(out, 1).astype(o_ref.dtype)


def _round_down(x, m):
    return (x // m) * m


def _target_tile_bytes():
    try:
        kind = jax.devices()[0].device_kind.lower()
    except Exception:
        kind = ""
    if ("v5 lite" in kind) or ("v5e" in kind) or ("v5lite" in kind):
        return 4 * 1024 * 1024     # protect v5e's smaller VMEM budget / HBM rate
    return 8 * 1024 * 1024         # v6e / v7x: amortize ~0.35us/step overhead


def _pick_tiles(B, C, HW, dsize, target_bytes):
    # >= 2 blocks on the leading "parallel" batch axis keeps both v7x
    # TensorCores busy (no-op on v5e/v6e); cap block rows at 8.
    b_tile = max(1, min(8, pl.cdiv(B, 2)))
    # TODO(synk): for B == 1 the HW axis could be split across the two v7x
    # cores with partial accumulators combined in the wrapper.
    if HW <= 128:
        return b_tile, HW

    def cap_for(bt):
        return max(128, _round_down(target_bytes // (bt * C * dsize), 128))

    # Keep each contiguous DMA row (hw_tile * dsize) long: shrink b_tile
    # before letting hw_tile fall below 512 lanes.
    while b_tile > 1 and cap_for(b_tile) < 512:
        b_tile -= 1
    hw_tile = min(_round_down(HW, 128), cap_for(b_tile))
    hw_tile = min(hw_tile, 16384)   # bound slab count / code size
    return b_tile, int(hw_tile)


def _vmem_budget_bytes(b_tile, C, hw_tile, acc_w, hidden, x_dsize, w_dsize):
    def pad(n, m):
        return ((n + m - 1) // m) * m
    c8 = pad(C, 8)
    x_blk = b_tile * c8 * pad(hw_tile, 128) * x_dsize
    w_blk = (c8 * pad(hidden, 128) + pad(hidden, 8) * pad(C, 128)) * w_dsize
    out_blk = b_tile * 8 * pad(C, 128) * x_dsize
    acc = 2 * b_tile * c8 * pad(acc_w, 128) * 4
    total = 2 * x_blk + 2 * w_blk + 2 * out_blk + acc + (2 << 20)  # + headroom
    # At least the usual scoped budget, never above v7x's 64 MiB physical.
    return int(min(max(total, 32 * 1024 * 1024), 64 * 1024 * 1024))


def channel_attention(x, w1, w2, *, b_tile=None, hw_tile=None):
    """x: (B, C, H, W) NCHW.  w1: (C//r, C, 1, 1).  w2: (C, C//r, 1, 1).
    Returns (B, C, 1, 1) like the PyTorch module."""
    B, C, H, W = x.shape
    hidden = w1.shape[0]
    HW = H * W

    # Glue: flatten spatial, squeeze+transpose conv weights to plain matrices.
    x3 = x.reshape(B, C, HW)
    w1t = jnp.transpose(w1.reshape(hidden, C))   # (C, hidden)
    w2t = jnp.transpose(w2.reshape(C, hidden))   # (hidden, C)

    dsize = jnp.dtype(x.dtype).itemsize
    auto_b, auto_hw = _pick_tiles(B, C, HW, dsize, _target_tile_bytes())

    if b_tile is None:
        b_tile = auto_b
    b_tile = max(1, min(int(b_tile), B))

    if hw_tile is None:
        hw_tile = auto_hw
    else:
        hw_tile = int(hw_tile)
        if HW > 128:
            hw_tile = max(128, min(_round_down(hw_tile, 128), _round_down(HW, 128)))
        else:
            hw_tile = HW
    acc_w = min(hw_tile, 128)

    n_b = pl.cdiv(B, b_tile)
    n_hw = pl.cdiv(HW, hw_tile)

    kernel = functools.partial(_channel_attention_kernel,
                               hw_total=HW, hw_tile=hw_tile, acc_w=acc_w)

    vmem_limit = _vmem_budget_bytes(b_tile, C, hw_tile, acc_w, hidden,
                                    dsize, jnp.dtype(w1.dtype).itemsize)

    out = pl.pallas_call(
        kernel,
        out_shape=jax.ShapeDtypeStruct((B, 1, C), x.dtype),
        grid=(n_b, n_hw),
        in_specs=[
            pl.BlockSpec((b_tile, C, hw_tile), lambda b, h: (b, 0, h)),
            pl.BlockSpec((C, hidden), lambda b, h: (0, 0)),   # weights resident
            pl.BlockSpec((hidden, C), lambda b, h: (0, 0)),
        ],
        out_specs=pl.BlockSpec((b_tile, 1, C), lambda b, h: (b, 0, 0)),
        scratch_shapes=[
            pltpu.VMEM((b_tile, C, acc_w), jnp.float32),   # running sum (lane-resident)
            pltpu.VMEM((b_tile, C, acc_w), jnp.float32),   # running max (lane-resident)
        ],
        compiler_params=pltpu.CompilerParams(
            dimension_semantics=("parallel", "arbitrary"),
            vmem_limit_bytes=vmem_limit),
    )(x3, w1t, w2t)

    return out.reshape(B, C, 1, 1)


def channel_attention_ref(x, w1, w2):
    """Pure-JAX reference mirroring the PyTorch forward."""
    B, C, H, W = x.shape
    hidden = w1.shape[0]
    avg = jnp.mean(x, axis=(2, 3))                 # (B, C)
    mx = jnp.max(x, axis=(2, 3))                   # (B, C)
    w1m = w1.reshape(hidden, C)
    w2m = w2.reshape(C, hidden)

    def mlp(p):
        h = jnp.maximum(p @ w1m.T, 0.0)
        return h @ w2m.T

    out = jax.nn.sigmoid(mlp(avg) + mlp(mx))
    return out.reshape(B, C, 1, 1)


if __name__ == "__main__":
    # Module hyperparams: in_planes must be divisible by ratio.
    B, C, H, W = 2, 32, 16, 16
    ratio = 16
    hidden = C // ratio

    key = jax.random.PRNGKey(0)
    kx, k1, k2, kx2 = jax.random.split(key, 4)

    x = jax.random.normal(kx, (B, C, H, W), dtype=jnp.float32)
    # Conv2d 1x1 weights, no bias:
    #   f1.weight: (C//ratio, C, 1, 1), f2.weight: (C, C//ratio, 1, 1)
    w1 = jax.random.normal(k1, (hidden, C, 1, 1), dtype=jnp.float32) * 0.1
    w2 = jax.random.normal(k2, (C, hidden, 1, 1), dtype=jnp.float32) * 0.1

    # Test 1: default tiling (single HW tile, 2 parallel batch blocks).
    out = channel_attention(x, w1, w2)
    out = jax.block_until_ready(out)
    ref = channel_attention_ref(x, w1, w2)
    assert out.shape == (B, C, 1, 1)
    assert jnp.allclose(out, ref, atol=1e-5, rtol=1e-5), "mismatch vs reference"

    # Test 2: multi-tile non-ragged accumulation path (HW=256, hw_tile=128).
    out_mt = channel_attention(x, w1, w2, b_tile=2, hw_tile=128)
    out_mt = jax.block_until_ready(out_mt)
    assert jnp.allclose(out_mt, ref, atol=1e-5, rtol=1e-5), "mismatch (multi-tile)"

    # Test 3: ragged HW tail (HW=160 with hw_tile=128) exercises the
    # masked-last-tile path.
    x2 = jax.random.normal(kx2, (B, C, 16, 10), dtype=jnp.float32)
    out2 = channel_attention(x2, w1, w2, hw_tile=128)
    out2 = jax.block_until_ready(out2)
    ref2 = channel_attention_ref(x2, w1, w2)
    assert jnp.allclose(out2, ref2, atol=1e-5, rtol=1e-5), "mismatch (ragged tail)"

    print("KERNEL_OK")
</pallas_src>

<mosaic_0001>
module attributes {stable_mosaic.version = 11 : i64} {
  func.func @_channel_attention_kernel(%arg0: i32, %arg1: i32, %arg2: memref<1x32x256xf32, #tpu.memory_space<vmem>>, %arg3: memref<32x2xf32, #tpu.memory_space<vmem>>, %arg4: memref<2x32xf32, #tpu.memory_space<vmem>>, %arg5: memref<1x1x32xf32, #tpu.memory_space<vmem>>, %arg6: memref<1x32x128xf32, #tpu.memory_space<vmem>>, %arg7: memref<1x32x128xf32, #tpu.memory_space<vmem>>) attributes {dimension_semantics = [#tpu.dimension_semantics<parallel>, #tpu.dimension_semantics<arbitrary>], iteration_bounds = array<i64: 2, 1>, scalar_prefetch = 0 : i64, scratch_operands = 2 : i64, tpu.core_type = #tpu.core_type<tc>, window_params = [{transform_indices = @transform_0, window_bounds = array<i64: 1, 32, 256>}, {pipeline_mode = #tpu.pipeline_mode<synchronous>, transform_indices = @transform_1, window_bounds = array<i64: 32, 2>}, {pipeline_mode = #tpu.pipeline_mode<synchronous>, transform_indices = @transform_2, window_bounds = array<i64: 2, 32>}, {transform_indices = @transform_3, window_bounds = array<i64: 1, 1, 32>}]} {
    %c0_i32 = arith.constant 0 : i32
    %0 = arith.cmpi eq, %arg1, %c0_i32 : i32
    %1 = arith.extui %0 : i1 to i32
    %c0_i32_0 = arith.constant 0 : i32
    %2 = arith.cmpi ne, %1, %c0_i32_0 : i32
    scf.if %2 {
      %cst = arith.constant 0.000000e+00 : f32
      %16 = vector.broadcast %cst : f32 to vector<1x32x128xf32>
      %c0_19 = arith.constant 0 : index
      %c0_20 = arith.constant 0 : index
      %c0_21 = arith.constant 0 : index
      %17 = vector.load %arg6[%c0_19, %c0_20, %c0_21] : memref<1x32x128xf32, #tpu.memory_space<vmem>>, vector<1x32x128xf32>
      tpu.vector_store %arg6[%c0_19, %c0_20, %c0_21], %16 {strides = array<i32>} : memref<1x32x128xf32, #tpu.memory_space<vmem>>, vector<1x32x128xf32>,
      %cst_22 = arith.constant 0xFF800000 : f32
      %18 = vector.broadcast %cst_22 : f32 to vector<1x32x128xf32>
      %c0_23 = arith.constant 0 : index
      %c0_24 = arith.constant 0 : index
      %c0_25 = arith.constant 0 : index
      %19 = vector.load %arg7[%c0_23, %c0_24, %c0_25] : memref<1x32x128xf32, #tpu.memory_space<vmem>>, vector<1x32x128xf32>
      tpu.vector_store %arg7[%c0_23, %c0_24, %c0_25], %18 {strides = array<i32>} : memref<1x32x128xf32, #tpu.memory_space<vmem>>, vector<1x32x128xf32>,
    } else {
    }
    %c0 = arith.constant 0 : index
    %c0_1 = arith.constant 0 : index
    %c0_2 = arith.constant 0 : index
    %3 = vector.load %arg2[%c0, %c0_1, %c0_2] : memref<1x32x256xf32, #tpu.memory_space<vmem>>, vector<1x32x128xf32>
    %c0_3 = arith.constant 0 : index
    %c0_4 = arith.constant 0 : index
    %c128 = arith.constant 128 : index
    %4 = vector.load %arg2[%c0_3, %c0_4, %c128] : memref<1x32x256xf32, #tpu.memory_space<vmem>>, vector<1x32x128xf32>
    %c0_5 = arith.constant 0 : index
    %c0_6 = arith.constant 0 : index
    %c0_7 = arith.constant 0 : index
    %5 = vector.load %arg6[%c0_5, %c0_6, %c0_7] : memref<1x32x128xf32, #tpu.memory_space<vmem>>, vector<1x32x128xf32>
    %6 = arith.addf %3, %4 : vector<1x32x128xf32>
    %7 = arith.addf %5, %6 : vector<1x32x128xf32>
    %c0_8 = arith.constant 0 : index
    %c0_9 = arith.constant 0 : index
    %c0_10 = arith.constant 0 : index
    %8 = vector.load %arg6[%c0_8, %c0_9, %c0_10] : memref<1x32x128xf32, #tpu.memory_space<vmem>>, vector<1x32x128xf32>
    tpu.vector_store %arg6[%c0_8, %c0_9, %c0_10], %7 {strides = array<i32>} : memref<1x32x128xf32, #tpu.memory_space<vmem>>, vector<1x32x128xf32>,
    %c0_11 = arith.constant 0 : index
    %c0_12 = arith.constant 0 : index
    %c0_13 = arith.constant 0 : index
    %9 = vector.load %arg7[%c0_11, %c0_12, %c0_13] : memref<1x32x128xf32, #tpu.memory_space<vmem>>, vector<1x32x128xf32>
    %10 = arith.maximumf %3, %4 : vector<1x32x128xf32>
    %11 = arith.maximumf %9, %10 : vector<1x32x128xf32>
    %c0_14 = arith.constant 0 : index
    %c0_15 = arith.constant 0 : index
    %c0_16 = arith.constant 0 : index
    %12 = vector.load %arg7[%c0_14, %c0_15, %c0_16] : memref<1x32x128xf32, #tpu.memory_space<vmem>>, vector<1x32x128xf32>
    tpu.vector_store %arg7[%c0_14, %c0_15, %c0_16], %11 {strides = array<i32>} : memref<1x32x128xf32, #tpu.memory_space<vmem>>, vector<1x32x128xf32>,
    %c0_i32_17 = arith.constant 0 : i32
    %13 = arith.cmpi eq, %arg1, %c0_i32_17 : i32
    %14 = arith.extui %13 : i1 to i32
    %c0_i32_18 = arith.constant 0 : i32
    %15 = arith.cmpi ne, %14, %c0_i32_18 : i32
    scf.if %15 {
      %c0_19 = arith.constant 0 : index
      %c0_20 = arith.constant 0 : index
      %c0_21 = arith.constant 0 : index
      %16 = vector.load %arg6[%c0_19, %c0_20, %c0_21] : memref<1x32x128xf32, #tpu.memory_space<vmem>>, vector<1x32x128xf32>
      %cst = arith.constant dense<0.000000e+00> : vector<1x32xf32>
      %17 = vector.multi_reduction <add>, %16, %cst [2] : vector<1x32x128xf32> to vector<1x32xf32>
      %cst_22 = arith.constant 3.906250e-03 : f32
      %18 = vector.broadcast %cst_22 : f32 to vector<1x32xf32>
      %19 = arith.mulf %17, %18 : vector<1x32xf32>
      %c0_23 = arith.constant 0 : index
      %c0_24 = arith.constant 0 : index
      %c0_25 = arith.constant 0 : index
      %20 = vector.load %arg7[%c0_23, %c0_24, %c0_25] : memref<1x32x128xf32, #tpu.memory_space<vmem>>, vector<1x32x128xf32>
      %cst_26 = arith.constant dense<0xFF800000> : vector<1x32xf32>
      %21 = vector.multi_reduction <maximumf>, %20, %cst_26 [2] : vector<1x32x128xf32> to vector<1x32xf32>
      %22 = tpu.concatenate %19, %21 in 0 : vector<1x32xf32>, vector<1x32xf32> -> vector<2x32xf32>
      %c0_27 = arith.constant 0 : index
      %c0_28 = arith.constant 0 : index
      %23 = vector.load %arg3[%c0_27, %c0_28] : memref<32x2xf32, #tpu.memory_space<vmem>>, vector<32x2xf32>
      %c0_29 = arith.constant 0 : index
      %c0_30 = arith.constant 0 : index
      %24 = vector.load %arg4[%c0_29, %c0_30] : memref<2x32xf32, #tpu.memory_space<vmem>>, vector<2x32xf32>
      %cst_31 = arith.constant dense<0.000000e+00> : vector<2x2xf32>
      %25 = tpu.matmul %22, %23, %cst_31 {dimension_numbers = #tpu.dot_dimension_numbers<[1], [0], [0], [1], [0, 0, 1, 1], [], []>} : vector<2x32xf32>, vector<32x2xf32>, vector<2x2xf32> -> vector<2x2xf32>
      %cst_32 = arith.constant 0.000000e+00 : f32
      %26 = vector.broadcast %cst_32 : f32 to vector<2x2xf32>
      %27 = arith.maximumf %25, %26 : vector<2x2xf32>
      %cst_33 = arith.constant dense<0.000000e+00> : vector<2x32xf32>
      %28 = tpu.matmul %27, %24, %cst_33 {dimension_numbers = #tpu.dot_dimension_numbers<[1], [0], [0], [1], [0, 0, 1, 1], [], []>} : vector<2x2xf32>, vector<2x32xf32>, vector<2x32xf32> -> vector<2x32xf32>
      %29 = vector.extract_strided_slice %28 {offsets = [0, 0], sizes = [1, 32], strides = [1, 1]} : vector<2x32xf32> to vector<1x32xf32>
      %30 = vector.extract_strided_slice %28 {offsets = [1, 0], sizes = [1, 32], strides = [1, 1]} : vector<2x32xf32> to vector<1x32xf32>
      %31 = arith.addf %29, %30 : vector<1x32xf32>
      %32 = arith.negf %31 : vector<1x32xf32>
      %33 = math.exp %32 : vector<1x32xf32>
      %cst_34 = arith.constant 1.000000e+00 : f32
      %34 = vector.broadcast %cst_34 : f32 to vector<1x32xf32>
      %35 = arith.addf %34, %33 : vector<1x32xf32>
      %36 = arith.divf %34, %35 : vector<1x32xf32>
      %37 = vector.shape_cast %36 : vector<1x32xf32> to vector<1x1x32xf32>
      %c0_35 = arith.constant 0 : index
      %c0_36 = arith.constant 0 : index
      %c0_37 = arith.constant 0 : index
      %38 = vector.load %arg5[%c0_35, %c0_36, %c0_37] : memref<1x1x32xf32, #tpu.memory_space<vmem>>, vector<1x1x32xf32>
      tpu.vector_store %arg5[%c0_35, %c0_36, %c0_37], %37 {strides = array<i32>} : memref<1x1x32xf32, #tpu.memory_space<vmem>>, vector<1x1x32xf32>,
    } else {
    }
    return
  }
  func.func @transform_0(%arg0: i32, %arg1: i32) -> (i32, i32, i32) {
    %c0_i32 = arith.constant 0 : i32
    %c0_i32_0 = arith.constant 0 : i32
    return %arg0, %c0_i32, %arg1 : i32, i32, i32
  }
  func.func @transform_1(%arg0: i32, %arg1: i32) -> (i32, i32) {
    %c0_i32 = arith.constant 0 : i32
    %c0_i32_0 = arith.constant 0 : i32
    %c0_i32_1 = arith.constant 0 : i32
    return %c0_i32, %c0_i32_0 : i32, i32
  }
  func.func @transform_2(%arg0: i32, %arg1: i32) -> (i32, i32) {
    %c0_i32 = arith.constant 0 : i32
    %c0_i32_0 = arith.constant 0 : i32
    %c0_i32_1 = arith.constant 0 : i32
    return %c0_i32, %c0_i32_0 : i32, i32
  }
  func.func @transform_3(%arg0: i32, %arg1: i32) -> (i32, i32, i32) {
    %c0_i32 = arith.constant 0 : i32
    %c0_i32_0 = arith.constant 0 : i32
    %c0_i32_1 = arith.constant 0 : i32
    return %arg0, %c0_i32, %c0_i32_0 : i32, i32, i32
  }
}

</mosaic_0001>

<bundles_post_ra>
// kernel: tpu_custom_call.1
= control target key start
LH: loop header
LB: loop body
LE: loop exit
PB: predicated region body
PF: predicated region fallthrough
CT: control target
= control target key end

     0   :  { %8 = vsyncpa [#allocation5], 0  ;;  %s853_s0 = inlined_call_operand.hbm [shape: f32[2,32,256], index: 0, kind: input, shape index: {}]   ;;  %s854_s1 = inlined_call_operand.vmem [shape: f32[32,2], index: 1, kind: input, shape index: {}]   ;;  %s855_s2 = inlined_call_operand.vmem [shape: f32[2,32], index: 2, kind: input, shape index: {}]   ;;  %s856_s3 = inlined_call_operand.hbm [shape: f32[2,1,32], index: 3, kind: output, shape index: {}]  }
   0x1   :  { %10 = vsyncpa [#allocation5 + $0x1], 0 }
   0x2   :  { %11 = vsyncpa [#allocation6], 0 }
   0x3   :  { %13 = vsyncpa [#allocation6 + $0x1], 0  ;;  %s717_s12 = smov 0   ;;  %s719_s13 = smov 0  }
   0x4   :  { %s721_s14 = smov 0   ;;  %s723_s15 = smov 0  }
   0x5   :  { %s725_s16 = smov 0   ;;  %s727_s17 = smov 0  }
   0x6 LB: > { %s497_s18 = sadd.s32 4294967295, %s693_s17   ;;  %s498_s19 = sadd.s32 4294967294, %s693_s17   ;;  %s693_s17 = sphi %s727_s17, %s19_s17   ;;  %s689_s16 = sphi %s725_s16, %s865_s16   ;;  %s685_s15 = sphi %s723_s15, %s864_s15   ;;  %s681_s14 = sphi %s721_s14, %s863_s14   ;;  %s677_s13 = sphi %s719_s13, %s862_s13   ;;  %s673_s12 = sphi %s717_s12, %s861_s12  }
   0x7   : > { %s31_s20 = sadd.s32 1, %s689_s16  ;;  %s40_s21 = sadd.s32 1, %s681_s14 }
   0x8   : > { %p33_p0 = scmp.ge.s32.totalorder %s31_s20, 2  ;;  %p47_p1 = scmp.ne.s32.totalorder %s681_s14, %s677_s13 }
   0x9   : > { %p48_p2 = scmp.eq.s32.totalorder %s693_s17, 0  ;;  %p53_p3 = scmp.ne.s32.totalorder %s677_s13, %s673_s12 }
   0xa   : > { %s867_s20 = smov (%p33_p0, %s31_s20), 0  ;;  %p54_p5 = scmp.eq.s32.totalorder %s497_s18, 0 }
   0xb   : > { %p758_p4 = por %p48_p2, %p47_p1  ;;  %s35_s23 = ssub.s32 %s689_s16, %s867_s20 }
   0xc   : > { %p119_p6 = scmp.eq.s32.totalorder %s497_s18, 1  ;;  %p38_p7 = scmp.eq.s32.totalorder %s35_s23, 0 }
   0xd   : > { %p764_p8 = por %p54_p5, %p53_p3  ;;  %p125_p10 = scmp.eq.s32.totalorder %s498_s19, 1 }
   0xe   : > { %p768_p9 = por %p119_p6, %p47_p1  ;;  %p500_p12 = scmp.ge.s32.totalorder %s693_s17, 2 }
   0xf   : > { %s773_s26 = scalar_select %p38_p7, %s681_s14, %s40_s21  }
  0x10   : > { %p775_p11 = por %p125_p10, %p53_p3  ;;  %p525_p13 = scmp.lt.s32.totalorder %s693_s17, 2 }
  0x11   : > { %s151_s28 = sand.u32 1, %s681_s14   ;;  %s512_s30 = sshll.u32 %s689_s16, 6 }
  0x12   : > { %s501_s29 = sshll.u32 %s151_s28, 6  ;;  %s162_s6 = scalar_lea.hbm %s853_s0, %s512_s30 }
  0x13   : > { %s155_s7 = scalar_lea.vmem [#allocation4], %s501_s29  ;;  %s163_s9 = sshll.u32 %s162_s6, 4  ;;  %s164_s9 = int_to_ptr.hbm [resolvable:$true] %s163_s9 }
  0x14   : > { %s165_s8 = sshll.u32 %s155_s7, 4  ;;  %p518_p0 = pnand %p525_p13, %p758_p4  ;;  %s166_s8 = int_to_ptr.vmem [resolvable:$true] %s165_s8 }
  0x15   : > { %p504_p1 = scmp.ge.s32.totalorder %s693_s17, 1  ;;  %s152_s10 = scalar_lea.sflag [#allocation5], %s151_s28 }
  0x16   : > { %s695_s11 = smov 256   ;;  %s696_s18 = smov 16  }
  0x17   : > { %520 = dma.hbm_to_vmem [thread:$0]  (!%p518_p0), %s164_s9, 1024, %s166_s8, %s152_s10, %s695_s11, %s695_s11, %s696_s18  }
  0x18   : > { %p173_p2 = scmp.lt.s32.totalorder %s693_s17, 3 }
  0x1a   : > { %p174_p3 = pnand %p504_p1, %p173_p2 }
  0x1b   : > { %s791_s19 = sand.u32 (!%p174_p3), 1, %s677_s13  }
  0x1c   : > { %177 = sbr.rel (%p174_p3) target bundleno = 463 (0x1cf), region = 32  ;;  %s505_s21 = sshll.u32 (!%p174_p3), %s791_s19, 6 }
  0x1d   : > { %s180_s23 = scalar_lea.sflag (!%p174_p3), [#allocation5], %s791_s19  ;;  %s183_s29 = scalar_lea.vmem (!%p174_p3), [#allocation4], %s505_s21 }
  0x21   : > { %664 = dma.done.wait (%p764_p8), %s180_s23, 1024  }
  0x22   : > { %666 = vsyncadd (%p764_p8), %s180_s23, 4294966272  ;;  %v219_v0 = vld [vmem:[%s183_s29] sm:$0xff]  ;;  %v223_v1 = vld [vmem:[%s183_s29 + $0x8] sm:$0xff]  ;;  %v294_v23 = vlaneseq  ;;  %vm299_vm0 = vcmask 130112   ;;  %vm303_vm1 = vcmask 195712   ;;  %vm307_vm2 = vcmask 261312   ;;  %s416_s18 = scalar_lea.hbm %s856_s3, %s685_s15 }
  0x23   : > { %v221_v2 = vld [vmem:[%s183_s29 + $0x20] sm:$0xff]  ;;  %v247_v3 = vmax.f32 %v219_v0, %v223_v1  ;;  %v231_v4 = vadd.f32 %v223_v1, %v219_v0  ;;  %v225_v5 = vld [vmem:[%s183_s29 + $0x28] sm:$0xff]  ;;  %v220_v7 = vld [vmem:[%s183_s29 + $0x10] sm:$0xff]  ;;  %vm322_vm3 = vcmask 1040384   ;;  %vm329_vm4 = vcmask 261120   ;;  %s205_s21 = scalar_lea.vmem [#allocation7], %s791_s19 }
  0x24   : > { %v233_v6 = vadd.f32 %v225_v5, %v221_v2  ;;  %v224_v8 = vld [vmem:[%s183_s29 + $0x18] sm:$0xff]  ;;  %v222_v9 = vld [vmem:[%s183_s29 + $0x30] sm:$0xff]  ;;  %v249_v14 = vmax.f32 %v221_v2, %v225_v5  ;;  %v325_v18 = vld [vmem:[%s854_s1 + $0x8] sm:$0xff]  ;;  %v295_v24 = vand.u32 127, %v294_v23  ;;  %vm358_vm5 = vcmask 1041408   ;;  %s418_s23 = sshll.u32 %s205_s21, 4  ;;  %s419_s23 = int_to_ptr.vmem [resolvable:$true] %s418_s23 }
  0x25   : > { %282 = vmax.xlane.f32.xlu2 %v247_v3  ;;  %266 = vadd.xlane.f32.xlu0 %v231_v4  ;;  %v226_v10 = vld [vmem:[%s183_s29 + $0x38] sm:$0xff]  ;;  %v248_v11 = vmax.f32 %v220_v7, %v224_v8  ;;  %v232_v12 = vadd.f32 %v224_v8, %v220_v7  ;;  %v326_v17 = vld [vmem:[%s854_s1 + $0x10] sm:$0xff]  ;;  %v324_v19 = vld [vmem:[%s854_s1] sm:$0xff]  ;;  %vm354_vm6 = vcmask 15360   ;;  %s420_s29 = sshll.u32 %s416_s18, 4  ;;  %vm405_vm10 = vcmask 253952   ;;  %s421_s29 = int_to_ptr.hbm [resolvable:$true] %s420_s29 }
  0x26   : > { %270 = vadd.xlane.f32.xlu1 %v233_v6  ;;  %v234_v13 = vadd.f32 %v226_v10, %v222_v9  ;;  %v250_v15 = vmax.f32 %v222_v9, %v226_v10  ;;  %v327_v16 = vld [vmem:[%s854_s1 + $0x18] sm:$0xff]  ;;  %v297_v27 = vadd.s32 4294967288, %v295_v24  ;;  %v301_v30 = vadd.s32 4294967280, %v295_v24  ;;  %v328_v52 = vld [vmem:[%s855_s2] sm:$0x3]  ;;  %s408_s15 = scalar_lea.sflag [#allocation6], %s791_s19 }
  0x27   : > { %345 = vmatpush.msra.mxu0 %v327_v16  ;;  %v305_v35 = vadd.s32 4294967272, %v295_v24  ;;  %507 = vmatpush.msk.msra.mxu1 %vm358_vm5, %v328_v52  ;;  %s625_s22 = sshra.s32 %s421_s29, 4  ;;  %s631_s4 = scalar_lea.hbm %s856_s3, 2  ;;  %s626_s22 = int_to_ptr.hbm [resolvable:$true] %s625_s22 }
  0x28   : > { %s627_s24 = scalar_lea.hbm %s626_s22, 1  ;;  %p632_p7 = scmp.lt.s32.totalorder %s626_s22, %s856_s3 }
  0x29   : > { %346 = vmatpush.msra.mxu0 %v326_v17  ;;  %p628_p4 = scmp.ne.s32.totalorder %s626_s22, %s627_s24  ;;  %p633_p8 = scmp.lt.s32.totalorder %s631_s4, %s627_s24 }
  0x2b   : > { %347 = vmatpush.msra.mxu0 %v325_v18  ;;  %p629_p5 = pnand %p628_p4, %p768_p9  ;;  %p634_p10 = por %p633_p8, %p632_p7 }
  0x2d   : > { %284 = vmax.xlane.f32.xlu2 %v248_v11  ;;  %268 = vadd.xlane.f32.xlu0 %v232_v12  ;;  %p630_p6 = pneg %p629_p5 }
  0x2e   : > { %272 = vadd.xlane.f32.xlu1 %v234_v13  ;;  %348 = vmatpush.msra.mxu0 %v324_v19 }
  0x2f   : > { %p635_p13 = pnand %p634_p10, %p630_p6 }
  0x35   : > { %286 = vmax.xlane.f32.xlu0 %v249_v14 }
  0x36   : > { %288 = vmax.xlane.f32.xlu1 %v250_v15 }
  0x98   : > { %v267_v20 = vpop.xlane.xlu0 %266  ;;  %v283_v21 = vpop.xlane.xlu2 %282 }
  0x99   : > { %v271_v22 = vpop.xlane.xlu1 %270  ;;  %v274_v25 = vmul.f32 0.00390625, %v267_v20  ;;  %v314_v37 = vperm.slane %v283_v21, %v295_v24 }
  0x9a   : > { %v276_v31 = vmul.f32 0.00390625, %v271_v22 }
  0x9b   : > { %v296_v34 = vperm.slane %v274_v25, %v295_v24 }
  0x9c   : > { %v302_v40 = vperm.slane %v276_v31, %v301_v30 }
  0xa0   : > { %v269_v26 = vpop.xlane.xlu0 %268  ;;  %v285_v32 = vpop.xlane.xlu2 %284 }
  0xa1   : > { %v275_v28 = vmul.f32 0.00390625, %v269_v26  ;;  %v273_v29 = vpop.xlane.xlu1 %272  ;;  %v315_v38 = vperm.slane %v285_v32, %v297_v27 }
  0xa2   : > { %v277_v36 = vmul.f32 0.00390625, %v273_v29 }
  0xa3   : > { %v298_v33 = vperm.slane %v275_v28, %v297_v27  ;;  %v316_v46 = vsel %vm299_vm0, %v315_v38, %v314_v37 }
  0xa4   : > { %v306_v41 = vperm.slane %v277_v36, %v305_v35 }
  0xa5   : > { %v300_v39 = vsel %vm299_vm0, %v298_v33, %v296_v34 }
  0xa6   : > { %v304_v45 = vsel %vm303_vm1, %v302_v40, %v300_v39 }
  0xa7   : > { %v308_v49 = vsel %vm307_vm2, %v306_v41, %v304_v45 }
  0xa8   : > { %v287_v42 = vpop.xlane.xlu0 %286 }
  0xa9   : > { %v317_v43 = vperm.slane %v287_v42, %v301_v30  ;;  %v289_v44 = vpop.xlane.xlu1 %288 }
  0xaa   : > { %v319_v47 = vperm.slane %v289_v44, %v305_v35 }
  0xab   : > { %v318_v48 = vsel %vm303_vm1, %v317_v43, %v316_v46 }
  0xac   : > { %v320_v50 = vsel %vm307_vm2, %v319_v47, %v318_v48 }
  0xad   : > { %v323_v51 = vsel %vm322_vm3, %v308_v49, %v320_v50 }
  0xae   : > { %506 = vmatmul.msk.f32.vlgmr.msra.gmra.mxu0 %vm329_vm4, %v323_v51 }
 0x12b   : > { %v350_v53 = vpop.f32.mrf.mxu0 }
 0x12c   : > { %v353_v54 = vmax.f32 %v350_v53, 0.0 }
 0x12e   : > { %508 = vmatmul.msk.f32.vlgmr.msra.gmra.mxu1 %vm354_vm6, %v353_v54 }
 0x1ab   : > { %v379_v55 = vpop.f32.mrf.mxu1 }
 0x1ac   : > { %v383_v56 = vrot.slane %v379_v55, 1 }
 0x1ae   : > { %v385_v57 = vadd.f32 %v383_v56, %v379_v55 }
 0x1b0   : > { %v509_v58 = vmul.f32 -1.442695, %v385_v57 }
 0x1b2   : > { %577 = vpow2.f32 %v509_v58 }
 0x1b8   : > { %v578_v59 = vpop.eup %577 }
 0x1b9   : > { %v389_v60 = vadd.f32 1.0, %v578_v59 }
 0x1bb   : > { %579 = vrcp.f32 %v389_v60  ;;  %v401_v0 = vand.u32 2147483648, %v389_v60  ;;  %v399_v2 = vand.u32 2147483647, %v389_v60  ;;  %vm395_vm8 = vweird.f32 %v389_v60 }
 0x1bd   : > { %v402_v4 = vor.u32 1.1754944e-38, %v401_v0  ;;  %vm400_vm11 = vcmp.eq.f32.partialorder %v399_v2, 8.507059e+37 }
 0x1c1   : > { %v580_v61 = vpop.eup %579 }
 0x1c2   : > { %v391_v62 = vmul.f32 %v580_v61, %v389_v60  ;;  %vm396_vm7 = vweird.f32 %v580_v61 }
 0x1c3   : > { %vm397_vm9 = vmor %vm395_vm8, %vm396_vm7 }
 0x1c4   : > { %v392_v63 = vsub.f32 1.0, %v391_v62 }
 0x1c6   : > { %v393_v1 = vmul.f32 %v580_v61, %v392_v63 }
 0x1c8   : > { %v394_v3 = vadd.f32 %v580_v61, %v393_v1 }
 0x1ca   : > { %v398_v5 = vsel %vm397_vm9, %v580_v61, %v394_v3 }
 0x1cb   : > { %v403_v6 = vsel %vm400_vm11, %v402_v4, %v398_v5 }
 0x1cc   : > { %406 = vst.msk [vmem:[%s205_s21] sm:$0x1] %vm405_vm10, %v403_v6 }
 0x1cd   : > { %638 = shalt.err (!%p635_p13)
}
 0x1ce   : > { %515 = dma.vmem_to_hbm [thread:$0]  (%p768_p9), %s419_s23, 16, %s421_s29, %s408_s15  }
 0x1cf PF: > { %s432_s19 = sand.u32 1, %s673_s12   ;;  %p522_p0 = pnand %p500_p12, %p775_p11 }
 0x1d0   : > { %s433_s7 = scalar_lea.sflag [#allocation6], %s432_s19 }
 0x1d1   : > { %p523_p1 = pneg %p522_p0 }
 0x1d3   : > { %668 = dma.done.wait (%p523_p1), %s433_s7, 16  }
 0x1d4   : > { %670 = vsyncadd (%p523_p1), %s433_s7, 4294967280  ;;  %s19_s17 = sadd.s32 1, %s693_s17   ;;  %s861_s12 = smov %s677_s13 }
 0x1d5   : > { %p16_p2 = scmp.ge.s32.totalorder %s19_s17, 4   ;;  %s862_s13 = smov %s681_s14 }
 0x1d6   : > { %s863_s14 = smov %s773_s26  ;;  %s864_s15 = smov %s689_s16 }
 0x1d7   : > { %s865_s16 = smov %s867_s20  ;;  %18 = sbr.rel (!%p16_p2) target bundleno = 6 (0x6), region = 85 }
 0x1dc   :  { %438 = vsyncpa [#allocation5], 1 }
 0x1dd   :  { %440 = vsyncpa [#allocation5 + $0x1], 1 }
 0x1de   :  { %441 = vsyncpa [#allocation6], 1 }
 0x1df   :  { %443 = vsyncpa [#allocation6 + $0x1], 1 }

</bundles_post_ra>
